<compile_context>
chip_gen: v5e
topology: v5e:2x2
jax: 0.10.0
libtpu: 0.0.40
codegen_flags: <defaults>
</compile_context>

<pallas_src>
import jax
import jax.numpy as jnp
from jax import lax
from jax.experimental import pallas as pl
from jax.experimental.pallas import tpu as pltpu


def _round_up(x, m):
    return ((x + m - 1) // m) * m


def _answer_kernel(w_a1_ref, mem_t_ref, w_out_ref, b_ref, out_ref):
    # w_a1_ref : (V, K)      bf16, whole-array VMEM resident
    # mem_t_ref: (BB*H, K)   bf16, rows are (example b, column h) pairs, k minor
    # w_out_ref: (H, 1)      f32,  whole-array VMEM resident
    # b_ref    : (1, 1)      f32,  SMEM scalar
    # out_ref  : (BB, V)     f32,  sublane-aligned, lane-dense
    BB, V = out_ref.shape
    H = mem_t_ref.shape[0] // BB

    # s[(b,h), v] = sum_k mem[b, k, h] * W_a1[v, k]  ==  (W_a1 @ mem_b)^T rows.
    # Single 2-D MXU matmul per grid step; bf16 inputs, f32 accumulate.
    s = lax.dot_general(
        mem_t_ref[...],
        w_a1_ref[...],
        dimension_numbers=(((1,), (1,)), ((), ())),   # contract k with k (A @ B^T)
        preferred_element_type=jnp.float32,
    )                                                  # (BB*H, V) f32

    t = jnp.tanh(s).reshape(BB, H, V)                  # EUP tanh in f32

    # out_a = Linear(H, 1): VPU multiply + sublane reduce over h, bias from SMEM.
    out_ref[...] = jnp.sum(t * w_out_ref[...], axis=1) + b_ref[0, 0]


def answer_module_forward(mem, question_h, params, *, max_block_b=256):
    """Batched AnswerModule forward.

    mem: (B, H, H) float — B stacked module inputs (the PyTorch module's
         (1, H, H) input is the B == 1 case).
    question_h: unused (matches the PyTorch forward).
    Returns (B, V): row b equals the module's (1, V) output for mem[b].
    """
    del question_h  # unused in the reference forward
    W_a1 = params["W_a1"]                                # (V, H)
    V, H = W_a1.shape
    B = mem.shape[0]
    assert mem.shape[1] == H and mem.shape[2] == H, mem.shape

    # Examples per grid step: sublane-aligned (multiple of 8); whole batch in a
    # single step when B is small (per review).  BB <= 256 keeps the per-step
    # VMEM footprint (double-buffered mem + f32 tanh intermediate) ~3 MB,
    # inside the scoped-VMEM default on v5e / v6e / v7x.
    BB = min(max_block_b, _round_up(B, 8))
    BB = _round_up(BB, 8)
    Bp = pl.cdiv(B, BB) * BB                             # padded batch

    # k-minor layout + bf16 for the dominant HBM stream (fuses with mem's
    # producer in a real pipeline; here it is a cheap XLA transpose+convert).
    mem_t = jnp.swapaxes(mem, 1, 2).astype(jnp.bfloat16)  # (B, H, K)
    if Bp != B:
        mem_t = jnp.pad(mem_t, ((0, Bp - B), (0, 0), (0, 0)))
    mem_t2d = mem_t.reshape(Bp * H, H)                     # (Bp*H, K), k minor

    w_a1_bf16 = W_a1.astype(jnp.bfloat16)                  # (V, K)
    w_out = params["out_a_w"].reshape(H, 1).astype(jnp.float32)
    b_out = params["out_a_b"].reshape(1, 1).astype(jnp.float32)

    grid = (Bp // BB,)
    out = pl.pallas_call(
        _answer_kernel,
        out_shape=jax.ShapeDtypeStruct((Bp, V), jnp.float32),
        grid=grid,
        in_specs=[
            pl.BlockSpec(memory_space=pltpu.MemorySpace.VMEM),   # W_a1: resident
            pl.BlockSpec((BB * H, H), lambda i: (i, 0)),         # mem chunk per step
            pl.BlockSpec(memory_space=pltpu.MemorySpace.VMEM),   # out_a weight: resident
            pl.BlockSpec(memory_space=pltpu.MemorySpace.SMEM),   # bias scalar
        ],
        out_specs=pl.BlockSpec((BB, V), lambda i: (i, 0)),       # (BB, V) aligned blocks
        compiler_params=pltpu.CompilerParams(
            # With >=2 batch chunks this shards across v7x's 2 TensorCores;
            # with grid=(1,) it is a harmless no-op.
            dimension_semantics=("parallel",),
        ),
    )(w_a1_bf16, mem_t2d, w_out, b_out)
    return out[:B]


def init_params(key, vocab_size, hidden_size):
    """Deterministic synthetic init mirroring the module's parameter shapes."""
    k1, k2, k3, k4, k5, k6 = jax.random.split(key, 6)
    stdv = 1.0 / jnp.sqrt(hidden_size)
    xavier = lambda k, shape: jax.random.normal(k, shape, jnp.float32) * jnp.sqrt(
        2.0 / (shape[0] + shape[1])
    )
    return {
        "W_a1": xavier(k1, (vocab_size, hidden_size)),
        "b_a1": jax.random.uniform(k2, (hidden_size,), jnp.float32, -stdv, stdv),
        "W_a2": jax.random.uniform(k3, (hidden_size,), jnp.float32, -stdv, stdv),
        "b_a2": jax.random.uniform(k4, (1,), jnp.float32, -stdv, stdv),
        "out_a_w": xavier(k5, (1, hidden_size)),                     # nn.Linear(H, 1).weight
        "out_a_b": jax.random.uniform(k6, (1,), jnp.float32, -stdv, stdv),
        # out1 / out2 / b_a1 / W_a2 / b_a2 are unused in forward; kept for shape parity
    }


if __name__ == "__main__":
    vocab_size, hidden_size = 64, 32
    key = jax.random.PRNGKey(0)
    kp, km, kq = jax.random.split(key, 3)

    params = init_params(kp, vocab_size, hidden_size)

    B = 8
    mem = jax.random.normal(km, (B, hidden_size, hidden_size), jnp.float32)
    question_h = jax.random.normal(kq, (B, hidden_size), jnp.float32)

    fwd = jax.jit(answer_module_forward, static_argnames=("max_block_b",))

    out = jax.block_until_ready(fwd(mem, question_h, params))
    assert out.shape == (B, vocab_size), out.shape

    # Pure-JAX references: per example b,
    #   (tanh(W_a1 @ mem[b]) @ out_a_w.T + out_a_b).permute(1, 0) -> row b of (B, V)
    def reference(mem_in, w_a1, w_o, b_o, cast_bf16=False):
        if cast_bf16:
            w_a1 = w_a1.astype(jnp.bfloat16)
            mem_in = mem_in.astype(jnp.bfloat16)
        t = jnp.tanh(jnp.einsum("vk,bkh->bvh", w_a1, mem_in,
                                preferred_element_type=jnp.float32))
        return jnp.einsum("bvh,h->bv", t, w_o) + b_o

    w_o = params["out_a_w"][0].astype(jnp.float32)
    b_o = params["out_a_b"][0].astype(jnp.float32)
    ref_f32 = reference(mem, params["W_a1"], w_o, b_o)
    ref_bf = reference(mem, params["W_a1"], w_o, b_o, cast_bf16=True)

    # Tight check vs a reference using the same bf16 input quantization / f32 accumulate.
    assert jnp.allclose(out, ref_bf, atol=2e-3, rtol=2e-3), float(
        jnp.max(jnp.abs(out - ref_bf)))
    # Loose check vs the full-f32 module semantics (bf16 mem/W_a1 quantization error).
    assert jnp.allclose(out, ref_f32, atol=5e-2, rtol=5e-2), float(
        jnp.max(jnp.abs(out - ref_f32)))

    # Original single-call semantics (mem of shape (1, H, H) -> output (1, V)).
    out1 = jax.block_until_ready(fwd(mem[:1], question_h[:1], params))
    assert out1.shape == (1, vocab_size), out1.shape
    assert jnp.allclose(out1, ref_bf[:1], atol=2e-3, rtol=2e-3)

    # Multi-step grid + batch-padding path (B=20 is not a multiple of the block).
    B2 = 20
    mem2 = jax.random.normal(jax.random.PRNGKey(1),
                             (B2, hidden_size, hidden_size), jnp.float32)
    out2 = jax.block_until_ready(fwd(mem2, None, params, max_block_b=8))
    ref2 = reference(mem2, params["W_a1"], w_o, b_o, cast_bf16=True)
    assert out2.shape == (B2, vocab_size), out2.shape
    assert jnp.allclose(out2, ref2, atol=2e-3, rtol=2e-3), float(
        jnp.max(jnp.abs(out2 - ref2)))

    print("KERNEL_OK")
</pallas_src>

<mosaic_0001>
module attributes {stable_mosaic.version = 11 : i64} {
  func.func @_answer_kernel(%arg0: i32, %arg1: memref<64x32xbf16, #tpu.memory_space<vmem>>, %arg2: memref<256x32xbf16, #tpu.memory_space<vmem>>, %arg3: memref<32x1xf32, #tpu.memory_space<vmem>>, %arg4: memref<1x1xf32, #tpu.memory_space<smem>>, %arg5: memref<8x64xf32, #tpu.memory_space<vmem>>) attributes {dimension_semantics = [#tpu.dimension_semantics<parallel>], iteration_bounds = array<i64: 1>, scalar_prefetch = 0 : i64, scratch_operands = 0 : i64, tpu.core_type = #tpu.core_type<tc>, window_params = [{pipeline_mode = #tpu.pipeline_mode<synchronous>, transform_indices = @transform_0, window_bounds = array<i64: 64, 32>}, {transform_indices = @transform_1, window_bounds = array<i64: 256, 32>}, {pipeline_mode = #tpu.pipeline_mode<synchronous>, transform_indices = @transform_2, window_bounds = array<i64: 32, 1>}, {transform_indices = @transform_3, window_bounds = array<i64: 1, 1>}, {transform_indices = @transform_4, window_bounds = array<i64: 8, 64>}]} {
    %c0 = arith.constant 0 : index
    %c0_0 = arith.constant 0 : index
    %0 = vector.load %arg2[%c0, %c0_0] : memref<256x32xbf16, #tpu.memory_space<vmem>>, vector<256x32xbf16>
    %c0_1 = arith.constant 0 : index
    %c0_2 = arith.constant 0 : index
    %1 = vector.load %arg1[%c0_1, %c0_2] : memref<64x32xbf16, #tpu.memory_space<vmem>>, vector<64x32xbf16>
    %cst = arith.constant dense<0.000000e+00> : vector<256x64xf32>
    %2 = tpu.matmul %0, %1, %cst {dimension_numbers = #tpu.dot_dimension_numbers<[1], [1], [0], [0], [0, 0, 1, 0], [], []>} : vector<256x32xbf16>, vector<64x32xbf16>, vector<256x64xf32> -> vector<256x64xf32>
    %3 = math.tanh %2 : vector<256x64xf32>
    %4 = vector.shape_cast %3 : vector<256x64xf32> to vector<8x32x64xf32>
    %c0_3 = arith.constant 0 : index
    %c0_4 = arith.constant 0 : index
    %5 = vector.load %arg3[%c0_3, %c0_4] : memref<32x1xf32, #tpu.memory_space<vmem>>, vector<32x1xf32>
    %6 = vector.shape_cast %5 : vector<32x1xf32> to vector<1x32x1xf32>
    %7 = vector.broadcast %6 : vector<1x32x1xf32> to vector<8x32x64xf32>
    %8 = arith.mulf %4, %7 : vector<8x32x64xf32>
    %cst_5 = arith.constant dense<0.000000e+00> : vector<8x64xf32>
    %9 = vector.multi_reduction <add>, %8, %cst_5 [1] : vector<8x32x64xf32> to vector<8x64xf32>
    %c0_6 = arith.constant 0 : index
    %c0_7 = arith.constant 0 : index
    %10 = memref.load %arg4[%c0_6, %c0_7] : memref<1x1xf32, #tpu.memory_space<smem>>
    %11 = vector.broadcast %10 : f32 to vector<8x64xf32>
    %12 = arith.addf %9, %11 : vector<8x64xf32>
    %c0_8 = arith.constant 0 : index
    %c0_9 = arith.constant 0 : index
    %13 = vector.load %arg5[%c0_8, %c0_9] : memref<8x64xf32, #tpu.memory_space<vmem>>, vector<8x64xf32>
    tpu.vector_store %arg5[%c0_8, %c0_9], %12 {strides = array<i32>} : memref<8x64xf32, #tpu.memory_space<vmem>>, vector<8x64xf32>,
    return
  }
  func.func @transform_0(%arg0: i32) -> (i32, i32) {
    %c0_i32 = arith.constant 0 : i32
    %c0_i32_0 = arith.constant 0 : i32
    %c0_i32_1 = arith.constant 0 : i32
    return %c0_i32, %c0_i32_0 : i32, i32
  }
  func.func @transform_1(%arg0: i32) -> (i32, i32) {
    %c0_i32 = arith.constant 0 : i32
    %c0_i32_0 = arith.constant 0 : i32
    return %arg0, %c0_i32 : i32, i32
  }
  func.func @transform_2(%arg0: i32) -> (i32, i32) {
    %c0_i32 = arith.constant 0 : i32
    %c0_i32_0 = arith.constant 0 : i32
    %c0_i32_1 = arith.constant 0 : i32
    return %c0_i32, %c0_i32_0 : i32, i32
  }
  func.func @transform_3(%arg0: i32) -> (i32, i32) {
    %c0_i32 = arith.constant 0 : i32
    %c0_i32_0 = arith.constant 0 : i32
    %c0_i32_1 = arith.constant 0 : i32
    return %c0_i32, %c0_i32_0 : i32, i32
  }
  func.func @transform_4(%arg0: i32) -> (i32, i32) {
    %c0_i32 = arith.constant 0 : i32
    %c0_i32_0 = arith.constant 0 : i32
    return %arg0, %c0_i32 : i32, i32
  }
}

</mosaic_0001>

<bundles_post_ra>
// kernel: answer_module_forward.1
= control target key start
LH: loop header
LB: loop body
LE: loop exit
PB: predicated region body
PF: predicated region fallthrough
CT: control target
= control target key end

     0   :  { %vm160_vm0 = vcmask 261120   ;;  %s977_s0 = inlined_call_operand.vmem [shape: bf16[64,32], index: 0, kind: input, shape index: {}]   ;;  %s978_s1 = inlined_call_operand.vmem [shape: bf16[256,32], index: 1, kind: input, shape index: {}]   ;;  %s979_s2 = inlined_call_operand.vmem [shape: f32[32,1], index: 2, kind: input, shape index: {}]   ;;  %s980_s3 = inlined_call_operand.<no memory space> [shape: f32[1,1], index: 3, kind: input, shape index: {}]   ;;  %s981_s4 = inlined_call_operand.hbm [shape: f32[8,64], index: 4, kind: output, shape index: {}]  }
   0x1   :  { %v668_v0 = vld [vmem:[%s977_s0 + $0x18] sm:$0xff] }
   0x2   :  { %v219_v1 = vsel %vm160_vm0, %v668_v0, 0 }
   0x3   :  { %225 = vmatpush.bf16.xpose.msra.mxu0 %v219_v1  ;;  %669 = vmatpush.bf16.xpose.msra.mxu1 %v219_v1 }
   0x4   :  { %10 = vsyncpa [#allocation4], 0  ;;  %670 = vmatpush.bf16.xpose.msra.mxu2 %v219_v1  ;;  %671 = vmatpush.bf16.xpose.msra.mxu3 %v219_v1  ;;  %v667_v2 = vld [vmem:[%s977_s0 + $0x10] sm:$0xff]  ;;  %v666_v4 = vld [vmem:[%s977_s0 + $0x8] sm:$0xff]  ;;  %v775_v8 = vmov 0   ;;  %vm398_vm1 = vcmask 523264  }
   0x5   :  { %v216_v3 = vsel %vm160_vm0, %v667_v2, 0  ;;  %v213_v5 = vsel %vm160_vm0, %v666_v4, 0  ;;  %v342_v6 = vld [vmem:[%s979_s2] sm:$0xff]  ;;  %683 = vset.pattern.permute.xlu0 %v775_v8  ;;  %684 = vset.pattern.permute.xlu1 %v775_v8  ;;  %v343_v10 = vld [vmem:[%s979_s2 + $0x8] sm:$0xff]  ;;  %v344_v15 = vld [vmem:[%s979_s2 + $0x10] sm:$0xff]  ;;  %vm521_vm2 = vcmask 1041409  }
   0x6   :  { %v665_v7 = vld [vmem:[%s977_s0] sm:$0xff]  ;;  %348 = vperm.xlu0 %683, %v342_v6   ;;  %358 = vperm.xlu1 %684, %v344_v15   ;;  %v345_v16 = vld [vmem:[%s979_s2 + $0x18] sm:$0xff]  ;;  %v650_v17 = vld [vmem:[%s978_s1 + $0x8] sm:$0xff]  ;;  %vm523_vm3 = vcmask 1042434   ;;  %vm525_vm4 = vcmask 1043459   ;;  %vm527_vm5 = vcmask 1044484  }
   0x7   :  { %v210_v9 = vsel %vm160_vm0, %v665_v7, 0  ;;  %v649_v11 = vld [vmem:[%s978_s1] sm:$0xff]  ;;  %v654_v18 = vld [vmem:[%s978_s1 + $0x28] sm:$0xff]  ;;  %v651_v21 = vld [vmem:[%s978_s1 + $0x10] sm:$0xff]  ;;  %vm529_vm6 = vcmask 1045509   ;;  %vm531_vm7 = vcmask 1046534  }
   0x8   :  { %v653_v12 = vld [vmem:[%s978_s1 + $0x20] sm:$0xff]  ;;  %v658_v19 = vld [vmem:[%s978_s1 + $0x48] sm:$0xff]  ;;  %v655_v22 = vld [vmem:[%s978_s1 + $0x30] sm:$0xff]  ;;  %s544_s12 = sshll.u32 %s981_s4, 4  ;;  %vm533_vm8 = vcmask 1047559   ;;  %s545_s12 = int_to_ptr.hbm [resolvable:$true] %s544_s12 }
   0x9   :  { %v657_v13 = vld [vmem:[%s978_s1 + $0x40] sm:$0xff]  ;;  %v662_v20 = vld [vmem:[%s978_s1 + $0x68] sm:$0xff]  ;;  %v659_v23 = vld [vmem:[%s978_s1 + $0x50] sm:$0xff] }
   0xa   :  { %v661_v14 = vld [vmem:[%s978_s1 + $0x60] sm:$0xff]  ;;  %v663_v24 = vld [vmem:[%s978_s1 + $0x70] sm:$0xff]  ;;  %v652_v25 = vld [vmem:[%s978_s1 + $0x18] sm:$0xff] }
   0xb   :  { %226 = vmatpush.bf16.xpose.msra.mxu0 %v216_v3  ;;  %672 = vmatpush.bf16.xpose.msra.mxu1 %v216_v3  ;;  %v656_v26 = vld [vmem:[%s978_s1 + $0x38] sm:$0xff] }
   0xc   :  { %673 = vmatpush.bf16.xpose.msra.mxu2 %v216_v3  ;;  %674 = vmatpush.bf16.xpose.msra.mxu3 %v216_v3  ;;  %v660_v27 = vld [vmem:[%s978_s1 + $0x58] sm:$0xff] }
   0xd   :  { %v664_v28 = vld [vmem:[%s978_s1 + $0x78] sm:$0xff] }
   0xe   :  { %353 = vperm.xlu0 %683, %v343_v10   ;;  %363 = vperm.xlu1 %684, %v345_v16  }
  0x13   :  { %227 = vmatpush.bf16.xpose.msra.mxu0 %v213_v5  ;;  %675 = vmatpush.bf16.xpose.msra.mxu1 %v213_v5 }
  0x14   :  { %676 = vmatpush.bf16.xpose.msra.mxu2 %v213_v5  ;;  %677 = vmatpush.bf16.xpose.msra.mxu3 %v213_v5 }
  0x1b   :  { %228 = vmatpush.bf16.xpose.msra.mxu0 %v210_v9  ;;  %678 = vmatpush.bf16.xpose.msra.mxu1 %v210_v9 }
  0x1c   :  { %679 = vmatpush.bf16.xpose.msra.mxu2 %v210_v9  ;;  %680 = vmatpush.bf16.xpose.msra.mxu3 %v210_v9 }
  0x22   :  { %633 = vmatmul.msk.bf16.vlgmr.msra.gmra.mxu0 %vm160_vm0, %v649_v11  ;;  %637 = vmatmul.msk.bf16.vlgmr.msra.gmra.mxu1 %vm160_vm0, %v653_v12 }
  0x23   :  { %641 = vmatmul.msk.bf16.vlgmr.msra.gmra.mxu2 %vm160_vm0, %v657_v13  ;;  %645 = vmatmul.msk.bf16.vlgmr.msra.gmra.mxu3 %vm160_vm0, %v661_v14 }
  0x32   :  { %634 = vmatmul.msk.bf16.gmra.mxu0 %vm160_vm0, %v650_v17  ;;  %638 = vmatmul.msk.bf16.gmra.mxu1 %vm160_vm0, %v654_v18 }
  0x33   :  { %642 = vmatmul.msk.bf16.gmra.mxu2 %vm160_vm0, %v658_v19  ;;  %646 = vmatmul.msk.bf16.gmra.mxu3 %vm160_vm0, %v662_v20 }
  0x42   :  { %635 = vmatmul.msk.bf16.gmra.mxu0 %vm160_vm0, %v651_v21  ;;  %639 = vmatmul.msk.bf16.gmra.mxu1 %vm160_vm0, %v655_v22 }
  0x43   :  { %643 = vmatmul.msk.bf16.gmra.mxu2 %vm160_vm0, %v659_v23  ;;  %647 = vmatmul.msk.bf16.gmra.mxu3 %vm160_vm0, %v663_v24 }
  0x52   :  { %636 = vmatmul.msk.bf16.gmra.mxu0 %vm160_vm0, %v652_v25  ;;  %640 = vmatmul.msk.bf16.gmra.mxu1 %vm160_vm0, %v656_v26 }
  0x53   :  { %644 = vmatmul.msk.bf16.gmra.mxu2 %vm160_vm0, %v660_v27  ;;  %648 = vmatmul.msk.bf16.gmra.mxu3 %vm160_vm0, %v664_v28 }
  0x78   :  { %v894_v39 = vpop.permute.xlu0 %348  ;;  %v896_v44 = vpop.permute.xlu1 %358 }
  0x80   :  { %v898_v46 = vpop.permute.xlu0 %353  ;;  %v901_v57 = vpop.permute.xlu1 %363 }
  0x9f   :  { %v230_v29 = vpop.f32.mrf.mxu0  ;;  %v250_v30 = vpop.f32.mrf.mxu1 }
  0xa0   :  { %685 = vtanh.f32 %v230_v29 }
  0xa6   :  { %v270_v31 = vpop.f32.mrf.mxu2  ;;  %v290_v32 = vpop.f32.mrf.mxu3 }
  0xa7   :  { %v232_v33 = vpop.f32.mrf.mxu0  ;;  %v252_v34 = vpop.f32.mrf.mxu1 }
  0xa8   :  { %687 = vtanh.f32 %v232_v33  ;;  %v686_v45 = vpop.eup %685 }
  0xa9   :  { %689 = vtanh.f32 %v250_v30  ;;  %v366_v59 = vmul.f32 %v686_v45, %v894_v39 }
  0xab   :  { %v399_v5 = vsel %vm398_vm1, %v366_v59, 0.0 }
  0xae   :  { %v272_v35 = vpop.f32.mrf.mxu2  ;;  %v292_v36 = vpop.f32.mrf.mxu3 }
  0xaf   :  { %v235_v37 = vpop.f32.mrf.mxu0  ;;  %v255_v38 = vpop.f32.mrf.mxu1 }
  0xb0   :  { %691 = vtanh.f32 %v235_v37  ;;  %v688_v47 = vpop.eup %687 }
  0xb1   :  { %693 = vtanh.f32 %v252_v34  ;;  %v690_v50 = vpop.eup %689  ;;  %v367_v55 = vmul.f32 %v688_v47, %v898_v46 }
  0xb2   :  { %v374_v1 = vmul.f32 %v690_v50, %v894_v39 }
  0xb3   :  { %v400_v63 = vsel %vm398_vm1, %v367_v55, 0.0 }
  0xb4   :  { %v401_v10 = vadd.f32 %v400_v63, %v399_v5  ;;  %v425_v16 = vsel %vm398_vm1, %v374_v1, 0.0 }
  0xb6   :  { %v275_v40 = vpop.f32.mrf.mxu2  ;;  %v295_v41 = vpop.f32.mrf.mxu3 }
  0xb7   :  { %v237_v42 = vpop.f32.mrf.mxu0  ;;  %v257_v43 = vpop.f32.mrf.mxu1 }
  0xb8   :  { %695 = vtanh.f32 %v237_v42  ;;  %v692_v53 = vpop.eup %691 }
  0xb9   :  { %697 = vtanh.f32 %v255_v38  ;;  %v694_v54 = vpop.eup %693  ;;  %v368_v60 = vmul.f32 %v692_v53, %v896_v44 }
  0xba   :  { %699 = vtanh.f32 %v257_v43  ;;  %v375_v61 = vmul.f32 %v694_v54, %v898_v46 }
  0xbb   :  { %701 = vtanh.f32 %v270_v31  ;;  %v402_v6 = vsel %vm398_vm1, %v368_v60, 0.0 }
  0xbc   :  { %703 = vtanh.f32 %v290_v32  ;;  %v426_v11 = vsel %vm398_vm1, %v375_v61, 0.0  ;;  %v403_v17 = vadd.f32 %v402_v6, %v401_v10 }
  0xbd   :  { %705 = vtanh.f32 %v272_v35  ;;  %v427_v20 = vadd.f32 %v426_v11, %v425_v16 }
  0xbe   :  { %v277_v48 = vpop.f32.mrf.mxu2  ;;  %v297_v49 = vpop.f32.mrf.mxu3  ;;  %707 = vtanh.f32 %v292_v36 }
  0xbf   :  { %v240_v51 = vpop.f32.mrf.mxu0  ;;  %v260_v52 = vpop.f32.mrf.mxu1  ;;  %709 = vtanh.f32 %v275_v40 }
  0xc0   :  { %v696_v56 = vpop.eup %695  ;;  %711 = vtanh.f32 %v295_v41 }
  0xc1   :  { %v698_v58 = vpop.eup %697  ;;  %v369_v0 = vmul.f32 %v696_v56, %v901_v57  ;;  %713 = vtanh.f32 %v277_v48 }
  0xc2   :  { %v700_v62 = vpop.eup %699  ;;  %v376_v2 = vmul.f32 %v698_v58, %v896_v44  ;;  %715 = vtanh.f32 %v297_v49 }
  0xc3   :  { %v702_v9 = vpop.eup %701  ;;  %v377_v12 = vmul.f32 %v700_v62, %v901_v57  ;;  %v404_v14 = vsel %vm398_vm1, %v369_v0, 0.0  ;;  %717 = vtanh.f32 %v240_v51 }
  0xc4   :  { %v704_v13 = vpop.eup %703  ;;  %v428_v18 = vsel %vm398_vm1, %v376_v2, 0.0  ;;  %v405_v22 = vadd.f32 %v404_v14, %v403_v17  ;;  %v382_v25 = vmul.f32 %v702_v9, %v894_v39  ;;  %719 = vtanh.f32 %v260_v52 }
  0xc5   :  { %v706_v15 = vpop.eup %705  ;;  %v430_v23 = vsel %vm398_vm1, %v377_v12, 0.0  ;;  %v429_v27 = vadd.f32 %v428_v18, %v427_v20  ;;  %v390_v28 = vmul.f32 %v704_v13, %v894_v39 }
  0xc6   :  { %v280_v3 = vpop.f32.mrf.mxu2  ;;  %v300_v4 = vpop.f32.mrf.mxu3  ;;  %v383_v26 = vmul.f32 %v706_v15, %v898_v46  ;;  %v406_v40 = vrot.slane %v405_v22, 4  ;;  %v451_v41 = vsel %vm398_vm1, %v382_v25, 0.0 }
  0xc7   :  { %v242_v7 = vpop.f32.mrf.mxu0  ;;  %v262_v8 = vpop.f32.mrf.mxu1  ;;  %v431_v34 = vadd.f32 %v430_v23, %v429_v27  ;;  %v477_v43 = vsel %vm398_vm1, %v390_v28, 0.0 }
  0xc8   :  { %v708_v19 = vpop.eup %707  ;;  %721 = vtanh.f32 %v242_v7  ;;  %v452_v42 = vsel %vm398_vm1, %v383_v26, 0.0  ;;  %v407_v54 = vadd.f32 %v406_v40, %v405_v22 }
  0xc9   :  { %v710_v21 = vpop.eup %709  ;;  %v391_v29 = vmul.f32 %v708_v19, %v898_v46  ;;  %723 = vtanh.f32 %v262_v8  ;;  %v432_v50 = vrot.slane %v431_v34, 4  ;;  %v453_v53 = vadd.f32 %v452_v42, %v451_v41 }
  0xca   :  { %v712_v24 = vpop.eup %711  ;;  %v384_v33 = vmul.f32 %v710_v21, %v896_v44 }
  0xcb   :  { %v714_v32 = vpop.eup %713  ;;  %v392_v38 = vmul.f32 %v712_v24, %v896_v44  ;;  %v478_v45 = vsel %vm398_vm1, %v391_v29, 0.0  ;;  %v433_v1 = vadd.f32 %v432_v50, %v431_v34 }
  0xcc   :  { %v716_v37 = vpop.eup %715  ;;  %v385_v47 = vmul.f32 %v714_v32, %v901_v57  ;;  %v454_v51 = vsel %vm398_vm1, %v384_v33, 0.0  ;;  %v479_v58 = vadd.f32 %v478_v45, %v477_v43 }
  0xcd   :  { %v718_v48 = vpop.eup %717  ;;  %v393_v49 = vmul.f32 %v716_v37, %v901_v57  ;;  %v480_v55 = vsel %vm398_vm1, %v392_v38, 0.0  ;;  %v455_v60 = vadd.f32 %v454_v51, %v453_v53  ;;  %v434_v20 = vrot.slane %v433_v1, 2 }
  0xce   :  { %v282_v30 = vpop.f32.mrf.mxu2  ;;  %v302_v31 = vpop.f32.mrf.mxu3  ;;  %v456_v61 = vsel %vm398_vm1, %v385_v47, 0.0  ;;  %v481_v2 = vadd.f32 %v480_v55, %v479_v58  ;;  %v370_v8 = vmul.f32 %v718_v48, %v894_v39 }
  0xcf   :  { %v245_v35 = vpop.f32.mrf.mxu0  ;;  %v265_v36 = vpop.f32.mrf.mxu1  ;;  %v457_v11 = vadd.f32 %v456_v61, %v455_v60  ;;  %v435_v53 = vadd.f32 %v434_v20, %v433_v1 }
  0xd0   :  { %725 = vtanh.f32 %v245_v35  ;;  %v720_v52 = vpop.eup %719  ;;  %v412_v21 = vsel %vm398_vm1, %v370_v8, 0.0 }
  0xd1   :  { %727 = vtanh.f32 %v265_v36  ;;  %v722_v56 = vpop.eup %721  ;;  %v378_v12 = vmul.f32 %v720_v52, %v894_v39  ;;  %v458_v25 = vrot.slane %v457_v11, 4 }
  0xd2   :  { %729 = vtanh.f32 %v280_v3  ;;  %v724_v59 = vpop.eup %723  ;;  %v482_v3 = vsel %vm398_vm1, %v393_v49, 0.0  ;;  %v371_v9 = vmul.f32 %v722_v56, %v898_v46 }
  0xd3   :  { %731 = vtanh.f32 %v300_v4  ;;  %v408_v4 = vrot.slane %v407_v54, 2  ;;  %v379_v13 = vmul.f32 %v724_v59, %v898_v46  ;;  %v483_v15 = vadd.f32 %v482_v3, %v481_v2 }
  0xd4   :  { %733 = vtanh.f32 %v282_v30  ;;  %v413_v22 = vsel %vm398_vm1, %v371_v9, 0.0  ;;  %v438_v26 = vsel %vm398_vm1, %v378_v12, 0.0  ;;  %v459_v50 = vadd.f32 %v458_v25, %v457_v11 }
  0xd5   :  { %735 = vtanh.f32 %v302_v31  ;;  %v942_v24 = vadd.f32 %v408_v4, %v407_v54  ;;  %v439_v27 = vsel %vm398_vm1, %v379_v13, 0.0  ;;  %v484_v34 = vrot.slane %v483_v15, 4 }
  0xd6   :  { %v285_v62 = vpop.f32.mrf.mxu2  ;;  %v305_v63 = vpop.f32.mrf.mxu3  ;;  %v414_v36 = vadd.f32 %v413_v22, %v412_v21  ;;  %v440_v41 = vadd.f32 %v439_v27, %v438_v26  ;;  %v504_v27 = vstv %s980_s3  ;;  %s776_s3 = smov [#allocation3]  }
  0xd7   :  { %v726_v0 = vpop.eup %725  ;;  %737 = vtanh.f32 %v285_v62  ;;  %v247_v5 = vpop.f32.mrf.mxu0  ;;  %v410_v13 = vrot.slane %v942_v24, 1  ;;  %s542_s9 = sshll.u32 %s776_s3, 4  ;;  %s543_s9 = int_to_ptr.vmem [resolvable:$true] %s542_s9 }
  0xd8   :  { %v267_v6 = vpop.f32.mrf.mxu1  ;;  %v728_v7 = vpop.eup %727  ;;  %739 = vtanh.f32 %v305_v63  ;;  %v372_v16 = vmul.f32 %v726_v0, %v896_v44 }
  0xd9   :  { %v730_v10 = vpop.eup %729  ;;  %741 = vtanh.f32 %v247_v5  ;;  %v380_v18 = vmul.f32 %v728_v7, %v896_v44 }
  0xda   :  { %v732_v14 = vpop.eup %731  ;;  %743 = vtanh.f32 %v267_v6  ;;  %v386_v29 = vmul.f32 %v730_v10, %v894_v39  ;;  %v415_v31 = vsel %vm398_vm1, %v372_v16, 0.0  ;;  %v460_v6 = vrot.slane %v459_v50, 2 }
  0xdb   :  { %v734_v17 = vpop.eup %733  ;;  %v441_v38 = vsel %vm398_vm1, %v380_v18, 0.0  ;;  %v394_v45 = vmul.f32 %v732_v14, %v894_v39  ;;  %v416_v47 = vadd.f32 %v415_v31, %v414_v36 }
  0xdc   :  { %v736_v19 = vpop.eup %735  ;;  %v387_v30 = vmul.f32 %v734_v17, %v898_v46  ;;  %v442_v51 = vadd.f32 %v441_v38, %v440_v41  ;;  %v464_v58 = vsel %vm398_vm1, %v386_v29, 0.0  ;;  %v461_v20 = vadd.f32 %v460_v6, %v459_v50 }
  0xdd   :  { %v738_v23 = vpop.eup %737  ;;  %v395_v37 = vmul.f32 %v736_v19, %v898_v46  ;;  %v490_v61 = vsel %vm398_vm1, %v394_v45, 0.0  ;;  %v436_v19 = vrot.slane %v435_v53, 1  ;;  %v411_v29 = vadd.f32 %v410_v13, %v942_v24 }
  0xde   :  { %v740_v28 = vpop.eup %739  ;;  %v287_v32 = vpop.f32.mrf.mxu2  ;;  %v388_v42 = vmul.f32 %v738_v23, %v896_v44  ;;  %v465_v46 = vsel %vm398_vm1, %v387_v30, 0.0 }
  0xdf   :  { %v307_v33 = vpop.f32.mrf.mxu3  ;;  %v742_v35 = vpop.eup %741  ;;  %745 = vtanh.f32 %v287_v32  ;;  %v396_v48 = vmul.f32 %v740_v28, %v896_v44  ;;  %v491_v54 = vsel %vm398_vm1, %v395_v37, 0.0  ;;  %v485_v44 = vadd.f32 %v484_v34, %v483_v15 }
  0xe0   :  { %v744_v40 = vpop.eup %743  ;;  %v373_v43 = vmul.f32 %v742_v35, %v901_v57  ;;  %747 = vtanh.f32 %v307_v33  ;;  %v467_v39 = vsel %vm398_vm1, %v388_v42, 0.0  ;;  %v466_v62 = vadd.f32 %v465_v46, %v464_v58 }
  0xe1   :  { %v381_v49 = vmul.f32 %v744_v40, %v901_v57  ;;  %v493_v63 = vsel %vm398_vm1, %v396_v48, 0.0  ;;  %v492_v1 = vadd.f32 %v491_v54, %v490_v61  ;;  %v486_v12 = vrot.slane %v485_v44, 2 }
  0xe2   :  { %v417_v52 = vsel %vm398_vm1, %v373_v43, 0.0  ;;  %v468_v7 = vadd.f32 %v467_v39, %v466_v62  ;;  %v437_v32 = vadd.f32 %v436_v19, %v435_v53  ;;  %v462_v33 = vrot.slane %v461_v20, 1 }
  0xe3   :  { %v418_v55 = vadd.f32 %v417_v52, %v416_v47  ;;  %v443_v56 = vsel %vm398_vm1, %v381_v49, 0.0  ;;  %v494_v9 = vadd.f32 %v493_v63, %v492_v1  ;;  %v505_v42 = vadd.f32 %v504_v27, %v411_v29 }
  0xe4   :  { %v444_v59 = vadd.f32 %v443_v56, %v442_v51  ;;  %v463_v43 = vadd.f32 %v462_v33, %v461_v20  ;;  %v507_v47 = vadd.f32 %v504_v27, %v437_v32 }
  0xe5   :  { %v746_v60 = vpop.eup %745  ;;  %v419_v0 = vrot.slane %v418_v55, 4 }
  0xe6   :  { %v748_v2 = vpop.eup %747  ;;  %v445_v3 = vrot.slane %v444_v59, 4  ;;  %v389_v5 = vmul.f32 %v746_v60, %v901_v57 }
  0xe7   :  { %v420_v4 = vadd.f32 %v419_v0, %v418_v55  ;;  %v397_v8 = vmul.f32 %v748_v2, %v901_v57  ;;  %v487_v57 = vadd.f32 %v486_v12, %v485_v44  ;;  %v509_v55 = vadd.f32 %v504_v27, %v463_v43 }
  0xe8   :  { %v446_v10 = vadd.f32 %v445_v3, %v444_v59  ;;  %v469_v11 = vsel %vm398_vm1, %v389_v5, 0.0 }
  0xe9   :  { %v421_v14 = vrot.slane %v420_v4, 2  ;;  %v470_v15 = vadd.f32 %v469_v11, %v468_v7  ;;  %v495_v16 = vsel %vm398_vm1, %v397_v8, 0.0  ;;  %v488_v38 = vrot.slane %v487_v57, 1 }
  0xea   :  { %v447_v17 = vrot.slane %v446_v10, 2  ;;  %v496_v18 = vadd.f32 %v495_v16, %v494_v9 }
  0xeb   :  { %v422_v21 = vadd.f32 %v421_v14, %v420_v4  ;;  %v471_v22 = vrot.slane %v470_v15, 4  ;;  %v489_v50 = vadd.f32 %v488_v38, %v487_v57 }
  0xec   :  { %v448_v23 = vadd.f32 %v447_v17, %v446_v10  ;;  %v497_v25 = vrot.slane %v496_v18, 4 }
  0xed   :  { %v423_v26 = vrot.slane %v422_v21, 1  ;;  %v472_v28 = vadd.f32 %v471_v22, %v470_v15  ;;  %v511_v58 = vadd.f32 %v504_v27, %v489_v50 }
  0xee   :  { %v449_v30 = vrot.slane %v448_v23, 1  ;;  %v498_v31 = vadd.f32 %v497_v25, %v496_v18 }
  0xef   :  { %v424_v34 = vadd.f32 %v423_v26, %v422_v21  ;;  %v473_v35 = vrot.slane %v472_v28, 2 }
  0xf0   :  { %v450_v36 = vadd.f32 %v449_v30, %v448_v23  ;;  %v499_v37 = vrot.slane %v498_v31, 2 }
  0xf1   :  { %v506_v40 = vadd.f32 %v504_v27, %v424_v34  ;;  %v474_v41 = vadd.f32 %v473_v35, %v472_v28 }
  0xf2   :  { %v500_v45 = vadd.f32 %v499_v37, %v498_v31  ;;  %v508_v48 = vadd.f32 %v504_v27, %v450_v36 }
  0xf3   :  { %v475_v24 = vrot.slane %v474_v41, 1  ;;  %v522_v49 = vsel %vm521_vm2, %v506_v40, %v505_v42 }
  0xf4   :  { %v501_v46 = vrot.slane %v500_v45, 1  ;;  %v524_v51 = vsel %vm523_vm3, %v507_v47, %v522_v49 }
  0xf5   :  { %v476_v52 = vadd.f32 %v475_v24, %v474_v41  ;;  %v526_v53 = vsel %vm525_vm4, %v508_v48, %v524_v51 }
  0xf6   :  { %v502_v54 = vadd.f32 %v501_v46, %v500_v45  ;;  %v528_v39 = vsel %vm527_vm5, %v509_v55, %v526_v53 }
  0xf7   :  { %v510_v56 = vadd.f32 %v504_v27, %v476_v52 }
  0xf8   :  { %v512_v59 = vadd.f32 %v504_v27, %v502_v54 }
  0xf9   :  { %v530_v44 = vsel %vm529_vm6, %v510_v56, %v528_v39 }
  0xfa   :  { %v532_v60 = vsel %vm531_vm7, %v511_v58, %v530_v44 }
  0xfb   :  { %v534_v61 = vsel %vm533_vm8, %v512_v59, %v532_v60 }
  0xfc   :  { %536 = vst.msk [vmem:[#allocation3] sm:$0xff] %vm398_vm1, %v534_v61 }
  0xfd   :  { %547 = dma.vmem_to_hbm [thread:$0]  %s543_s9, 128, %s545_s12, [#allocation4]  }
  0xfe   :  { %773 = dma.done.wait [#allocation4], 128  }
  0xff   :  { %774 = vsyncadd [#allocation4], 4294967168 }
 0x100   :  { %552 = vsyncpa [#allocation4], 1 }

</bundles_post_ra>
